<compile_context>
chip_gen: v6e
topology: v6e:2x2x1
jax: 0.10.0
libtpu: 0.0.40
codegen_flags: <defaults>
</compile_context>

<pallas_src>
import functools

import jax
import jax.numpy as jnp
from jax import lax
from jax.experimental import pallas as pl
from jax.experimental.pallas import tpu as pltpu


def _round_up(n, m):
    return ((n + m - 1) // m) * m


def _adaptive_double_norm_kernel(x_ref, t_ref, gamma_ref,
                                 w1_ref, b1_ref,
                                 w2s_ref, b2s_ref,
                                 w2b_ref, b2b_ref,
                                 out_ref, *, eps, mxu_dtype):
    # ---- RMSNorm(x) (f32 math regardless of wire dtype) ----
    x = x_ref[...].astype(jnp.float32)                       # (TM, D)
    gamma = gamma_ref[...]                                    # (1, D) f32
    inv_rms_x = lax.rsqrt(jnp.mean(x * x, axis=-1, keepdims=True) + eps)
    normalized = x * inv_rms_x * gamma

    # ---- MLP on t_emb: Linear(D -> 2D) -> SiLU -> split Linear(2D -> D) x2 ----
    t = t_ref[...].astype(mxu_dtype)                          # bf16 (or f32) MXU operand
    h = jnp.dot(t, w1_ref[...], preferred_element_type=jnp.float32) + b1_ref[...]
    h = h * jax.nn.sigmoid(h)                                 # SiLU in f32
    h = h.astype(mxu_dtype)
    scale = jnp.dot(h, w2s_ref[...], preferred_element_type=jnp.float32) + b2s_ref[...]
    bias = jnp.dot(h, w2b_ref[...], preferred_element_type=jnp.float32) + b2b_ref[...]

    # ---- RMS-normalize scale / bias (eps hard-coded to 1e-8 per the module) ----
    scale = scale * lax.rsqrt(jnp.mean(scale * scale, axis=-1, keepdims=True) + 1e-8)
    bias = bias * lax.rsqrt(jnp.mean(bias * bias, axis=-1, keepdims=True) + 1e-8)

    out_ref[...] = (normalized * (1.0 + scale) + bias).astype(out_ref.dtype)


def prepare_adaptive_double_norm_params(gamma, w1, b1, w2, b2,
                                        *, matmul_dtype=jnp.bfloat16):
    """One-time parameter prep (hoisted out of the per-call path).

    gamma: (D,)   w1: (2D, D)  b1: (2D,)  w2: (2D, 2D)  b2: (2D,)
    (PyTorch nn.Linear convention: y = x @ W^T + b).
    """
    D = gamma.shape[-1]
    gamma2 = gamma.reshape(1, D).astype(jnp.float32)
    w1_t = jnp.transpose(w1).astype(matmul_dtype)             # (D, 2D)
    b1_2 = b1.reshape(1, 2 * D).astype(jnp.float32)
    # Split the second Linear into the scale- and bias-producing halves.
    w2_scale_t = jnp.transpose(w2[:D]).astype(matmul_dtype)   # (2D, D)
    w2_bias_t = jnp.transpose(w2[D:]).astype(matmul_dtype)    # (2D, D)
    b2_scale = b2[:D].reshape(1, D).astype(jnp.float32)
    b2_bias = b2[D:].reshape(1, D).astype(jnp.float32)
    return (gamma2, w1_t, b1_2, w2_scale_t, b2_scale, w2_bias_t, b2_bias)


def adaptive_double_norm(x, t_emb, params, *, eps=1e-8, block_rows=512):
    """x, t_emb: (B, S, D) in their native dtype (f32 or bf16).
    params: output of prepare_adaptive_double_norm_params()."""
    gamma2, w1_t, b1_2, w2s_t, b2s, w2b_t, b2b = params
    B, S, D = x.shape
    M = B * S
    x2 = x.reshape(M, D)
    t2 = t_emb.reshape(M, D)

    # Row tile: multiple of 8 (sublane), capped so small problems are one block.
    # With TM=512 and D up to ~1024 the (x, t, out) double-buffers + bf16 weights
    # stay well under the 32 MiB default scoped VMEM on v5e/v6e/v7x; for much
    # larger D raise vmem_limit_bytes or shrink block_rows.
    tm = min(_round_up(block_rows, 8), _round_up(M, 8))
    m_pad = _round_up(M, tm)
    if m_pad != M:
        pad = ((0, m_pad - M), (0, 0))
        x2 = jnp.pad(x2, pad)
        t2 = jnp.pad(t2, pad)

    grid = (pl.cdiv(m_pad, tm),)
    row_spec = pl.BlockSpec((tm, D), lambda i: (i, 0))
    const = lambda shp: pl.BlockSpec(shp, lambda i: (0, 0))   # weights stay resident

    kernel = functools.partial(_adaptive_double_norm_kernel,
                               eps=eps, mxu_dtype=w1_t.dtype)

    out = pl.pallas_call(
        kernel,
        out_shape=jax.ShapeDtypeStruct((m_pad, D), x.dtype),
        grid_spec=pltpu.PrefetchScalarGridSpec(
            num_scalar_prefetch=0,
            grid=grid,
            in_specs=[
                row_spec,                 # x           (TM, D)
                row_spec,                 # t_emb       (TM, D)
                const((1, D)),            # gamma
                const((D, 2 * D)),        # W1^T
                const((1, 2 * D)),        # b1
                const((2 * D, D)),        # W2_scale^T
                const((1, D)),            # b2_scale
                const((2 * D, D)),        # W2_bias^T
                const((1, D)),            # b2_bias
            ],
            out_specs=row_spec,
        ),
        compiler_params=pltpu.CompilerParams(
            dimension_semantics=("parallel",),   # megacore sharding on v7x
        ),
    )(x2, t2, gamma2, w1_t, b1_2, w2s_t, b2s, w2b_t, b2b)

    return out[:M].reshape(B, S, D)


def _reference(x, t_emb, gamma, w1, b1, w2, b2, eps=1e-8):
    """Pure-JAX f32 reference mirroring the PyTorch module."""
    rms = jnp.sqrt(jnp.mean(x ** 2, axis=-1, keepdims=True) + eps)
    normalized = x / rms * gamma
    h = t_emb @ w1.T + b1
    h = h * jax.nn.sigmoid(h)
    sb = h @ w2.T + b2
    D = x.shape[-1]
    scale, bias = sb[..., :D], sb[..., D:]
    scale = scale / jnp.sqrt(jnp.mean(scale ** 2, -1, keepdims=True) + 1e-8)
    bias = bias / jnp.sqrt(jnp.mean(bias ** 2, -1, keepdims=True) + 1e-8)
    return normalized * (1 + scale) + bias


if __name__ == "__main__":
    key = jax.random.PRNGKey(0)
    kx, kt, kw1, kb1, kw2, kb2 = jax.random.split(key, 6)

    def make_inputs(B, S, D):
        x = jax.random.normal(kx, (B, S, D), dtype=jnp.float32)
        t_emb = jax.random.normal(kt, (B, S, D), dtype=jnp.float32)
        gamma = jnp.ones((D,), dtype=jnp.float32)                       # RMSNorm.scale
        w1 = jax.random.normal(kw1, (2 * D, D), jnp.float32) * 0.05     # Linear(D, 2D)
        b1 = jax.random.normal(kb1, (2 * D,), jnp.float32) * 0.05
        w2 = jax.random.normal(kw2, (2 * D, 2 * D), jnp.float32) * 0.05 # Linear(2D, 2D)
        b2 = jax.random.normal(kb2, (2 * D,), jnp.float32) * 0.05
        return x, t_emb, gamma, w1, b1, w2, b2

    # --- Run 1: M not a multiple of the tile (exercises padding), f32 MXU path,
    #            tight tolerance against the f32 reference. ---
    B, S, D = 3, 5, 128
    x, t_emb, gamma, w1, b1, w2, b2 = make_inputs(B, S, D)
    params_f32 = prepare_adaptive_double_norm_params(
        gamma, w1, b1, w2, b2, matmul_dtype=jnp.float32)
    out = adaptive_double_norm(x, t_emb, params_f32)
    jax.block_until_ready(out)
    ref = _reference(x, t_emb, gamma, w1, b1, w2, b2)
    assert out.shape == (B, S, D)
    assert jnp.allclose(out, ref, atol=1e-5, rtol=1e-5)

    # --- Run 2: default bf16 MXU operands (f32 accumulation), looser tolerance. ---
    B, S, D = 2, 8, 128
    x, t_emb, gamma, w1, b1, w2, b2 = make_inputs(B, S, D)
    params_bf16 = prepare_adaptive_double_norm_params(gamma, w1, b1, w2, b2)
    out_bf = adaptive_double_norm(x, t_emb, params_bf16)
    jax.block_until_ready(out_bf)
    ref_bf = _reference(x, t_emb, gamma, w1, b1, w2, b2)
    assert out_bf.shape == (B, S, D)
    assert jnp.allclose(out_bf, ref_bf, atol=3e-2, rtol=3e-2)

    print("KERNEL_OK")
</pallas_src>

<mosaic_0001>
module attributes {stable_mosaic.version = 11 : i64} {
  func.func @_adaptive_double_norm_kernel(%arg0: i32, %arg1: memref<16x128xf32, #tpu.memory_space<vmem>>, %arg2: memref<16x128xf32, #tpu.memory_space<vmem>>, %arg3: memref<1x128xf32, #tpu.memory_space<vmem>>, %arg4: memref<128x256xf32, #tpu.memory_space<vmem>>, %arg5: memref<1x256xf32, #tpu.memory_space<vmem>>, %arg6: memref<256x128xf32, #tpu.memory_space<vmem>>, %arg7: memref<1x128xf32, #tpu.memory_space<vmem>>, %arg8: memref<256x128xf32, #tpu.memory_space<vmem>>, %arg9: memref<1x128xf32, #tpu.memory_space<vmem>>, %arg10: memref<16x128xf32, #tpu.memory_space<vmem>>) attributes {dimension_semantics = [#tpu.dimension_semantics<parallel>], iteration_bounds = array<i64: 1>, scalar_prefetch = 0 : i64, scratch_operands = 0 : i64, tpu.core_type = #tpu.core_type<tc>, window_params = [{transform_indices = @transform_0, window_bounds = array<i64: 16, 128>}, {transform_indices = @transform_1, window_bounds = array<i64: 16, 128>}, {pipeline_mode = #tpu.pipeline_mode<synchronous>, transform_indices = @transform_2, window_bounds = array<i64: 1, 128>}, {pipeline_mode = #tpu.pipeline_mode<synchronous>, transform_indices = @transform_3, window_bounds = array<i64: 128, 256>}, {pipeline_mode = #tpu.pipeline_mode<synchronous>, transform_indices = @transform_4, window_bounds = array<i64: 1, 256>}, {pipeline_mode = #tpu.pipeline_mode<synchronous>, transform_indices = @transform_5, window_bounds = array<i64: 256, 128>}, {pipeline_mode = #tpu.pipeline_mode<synchronous>, transform_indices = @transform_6, window_bounds = array<i64: 1, 128>}, {pipeline_mode = #tpu.pipeline_mode<synchronous>, transform_indices = @transform_7, window_bounds = array<i64: 256, 128>}, {pipeline_mode = #tpu.pipeline_mode<synchronous>, transform_indices = @transform_8, window_bounds = array<i64: 1, 128>}, {transform_indices = @transform_9, window_bounds = array<i64: 16, 128>}]} {
    %c0 = arith.constant 0 : index
    %c0_0 = arith.constant 0 : index
    %0 = vector.load %arg1[%c0, %c0_0] : memref<16x128xf32, #tpu.memory_space<vmem>>, vector<16x128xf32>
    %c0_1 = arith.constant 0 : index
    %c0_2 = arith.constant 0 : index
    %1 = vector.load %arg3[%c0_1, %c0_2] : memref<1x128xf32, #tpu.memory_space<vmem>>, vector<1x128xf32>
    %2 = arith.mulf %0, %0 : vector<16x128xf32>
    %cst = arith.constant dense<0.000000e+00> : vector<16xf32>
    %3 = vector.multi_reduction <add>, %2, %cst [1] : vector<16x128xf32> to vector<16xf32>
    %4 = vector.shape_cast %3 : vector<16xf32> to vector<16x1xf32>
    %cst_3 = arith.constant 1.280000e+02 : f32
    %5 = vector.broadcast %cst_3 : f32 to vector<16x1xf32>
    %6 = arith.divf %4, %5 : vector<16x1xf32>
    %cst_4 = arith.constant 9.99999993E-9 : f32
    %7 = vector.broadcast %cst_4 : f32 to vector<16x1xf32>
    %8 = arith.addf %6, %7 : vector<16x1xf32>
    %9 = math.rsqrt %8 : vector<16x1xf32>
    %10 = vector.broadcast %9 : vector<16x1xf32> to vector<16x128xf32>
    %11 = arith.mulf %0, %10 : vector<16x128xf32>
    %12 = vector.broadcast %1 : vector<1x128xf32> to vector<16x128xf32>
    %13 = arith.mulf %11, %12 : vector<16x128xf32>
    %c0_5 = arith.constant 0 : index
    %c0_6 = arith.constant 0 : index
    %14 = vector.load %arg2[%c0_5, %c0_6] : memref<16x128xf32, #tpu.memory_space<vmem>>, vector<16x128xf32>
    %c0_7 = arith.constant 0 : index
    %c0_8 = arith.constant 0 : index
    %15 = vector.load %arg4[%c0_7, %c0_8] : memref<128x256xf32, #tpu.memory_space<vmem>>, vector<128x256xf32>
    %cst_9 = arith.constant dense<0.000000e+00> : vector<16x256xf32>
    %16 = tpu.matmul %14, %15, %cst_9 {dimension_numbers = #tpu.dot_dimension_numbers<[1], [0], [0], [1], [0, 0, 1, 1], [], []>} : vector<16x128xf32>, vector<128x256xf32>, vector<16x256xf32> -> vector<16x256xf32>
    %c0_10 = arith.constant 0 : index
    %c0_11 = arith.constant 0 : index
    %17 = vector.load %arg5[%c0_10, %c0_11] : memref<1x256xf32, #tpu.memory_space<vmem>>, vector<1x256xf32>
    %18 = vector.broadcast %17 : vector<1x256xf32> to vector<16x256xf32>
    %19 = arith.addf %16, %18 : vector<16x256xf32>
    %20 = arith.negf %19 : vector<16x256xf32>
    %21 = math.exp %20 : vector<16x256xf32>
    %cst_12 = arith.constant 1.000000e+00 : f32
    %22 = vector.broadcast %cst_12 : f32 to vector<16x256xf32>
    %23 = arith.addf %22, %21 : vector<16x256xf32>
    %24 = arith.divf %22, %23 : vector<16x256xf32>
    %25 = arith.mulf %19, %24 : vector<16x256xf32>
    %c0_13 = arith.constant 0 : index
    %c0_14 = arith.constant 0 : index
    %26 = vector.load %arg6[%c0_13, %c0_14] : memref<256x128xf32, #tpu.memory_space<vmem>>, vector<256x128xf32>
    %cst_15 = arith.constant dense<0.000000e+00> : vector<16x128xf32>
    %27 = tpu.matmul %25, %26, %cst_15 {dimension_numbers = #tpu.dot_dimension_numbers<[1], [0], [0], [1], [0, 0, 1, 1], [], []>} : vector<16x256xf32>, vector<256x128xf32>, vector<16x128xf32> -> vector<16x128xf32>
    %c0_16 = arith.constant 0 : index
    %c0_17 = arith.constant 0 : index
    %28 = vector.load %arg7[%c0_16, %c0_17] : memref<1x128xf32, #tpu.memory_space<vmem>>, vector<1x128xf32>
    %29 = vector.broadcast %28 : vector<1x128xf32> to vector<16x128xf32>
    %30 = arith.addf %27, %29 : vector<16x128xf32>
    %c0_18 = arith.constant 0 : index
    %c0_19 = arith.constant 0 : index
    %31 = vector.load %arg8[%c0_18, %c0_19] : memref<256x128xf32, #tpu.memory_space<vmem>>, vector<256x128xf32>
    %cst_20 = arith.constant dense<0.000000e+00> : vector<16x128xf32>
    %32 = tpu.matmul %25, %31, %cst_20 {dimension_numbers = #tpu.dot_dimension_numbers<[1], [0], [0], [1], [0, 0, 1, 1], [], []>} : vector<16x256xf32>, vector<256x128xf32>, vector<16x128xf32> -> vector<16x128xf32>
    %c0_21 = arith.constant 0 : index
    %c0_22 = arith.constant 0 : index
    %33 = vector.load %arg9[%c0_21, %c0_22] : memref<1x128xf32, #tpu.memory_space<vmem>>, vector<1x128xf32>
    %34 = vector.broadcast %33 : vector<1x128xf32> to vector<16x128xf32>
    %35 = arith.addf %32, %34 : vector<16x128xf32>
    %36 = arith.mulf %30, %30 : vector<16x128xf32>
    %cst_23 = arith.constant dense<0.000000e+00> : vector<16xf32>
    %37 = vector.multi_reduction <add>, %36, %cst_23 [1] : vector<16x128xf32> to vector<16xf32>
    %38 = vector.shape_cast %37 : vector<16xf32> to vector<16x1xf32>
    %cst_24 = arith.constant 1.280000e+02 : f32
    %39 = vector.broadcast %cst_24 : f32 to vector<16x1xf32>
    %40 = arith.divf %38, %39 : vector<16x1xf32>
    %cst_25 = arith.constant 9.99999993E-9 : f32
    %41 = vector.broadcast %cst_25 : f32 to vector<16x1xf32>
    %42 = arith.addf %40, %41 : vector<16x1xf32>
    %43 = math.rsqrt %42 : vector<16x1xf32>
    %44 = vector.broadcast %43 : vector<16x1xf32> to vector<16x128xf32>
    %45 = arith.mulf %30, %44 : vector<16x128xf32>
    %46 = arith.mulf %35, %35 : vector<16x128xf32>
    %cst_26 = arith.constant dense<0.000000e+00> : vector<16xf32>
    %47 = vector.multi_reduction <add>, %46, %cst_26 [1] : vector<16x128xf32> to vector<16xf32>
    %48 = vector.shape_cast %47 : vector<16xf32> to vector<16x1xf32>
    %cst_27 = arith.constant 1.280000e+02 : f32
    %49 = vector.broadcast %cst_27 : f32 to vector<16x1xf32>
    %50 = arith.divf %48, %49 : vector<16x1xf32>
    %cst_28 = arith.constant 9.99999993E-9 : f32
    %51 = vector.broadcast %cst_28 : f32 to vector<16x1xf32>
    %52 = arith.addf %50, %51 : vector<16x1xf32>
    %53 = math.rsqrt %52 : vector<16x1xf32>
    %54 = vector.broadcast %53 : vector<16x1xf32> to vector<16x128xf32>
    %55 = arith.mulf %35, %54 : vector<16x128xf32>
    %cst_29 = arith.constant 1.000000e+00 : f32
    %56 = vector.broadcast %cst_29 : f32 to vector<16x128xf32>
    %57 = arith.addf %56, %45 : vector<16x128xf32>
    %58 = arith.mulf %13, %57 : vector<16x128xf32>
    %59 = arith.addf %58, %55 : vector<16x128xf32>
    %c0_30 = arith.constant 0 : index
    %c0_31 = arith.constant 0 : index
    %60 = vector.load %arg10[%c0_30, %c0_31] : memref<16x128xf32, #tpu.memory_space<vmem>>, vector<16x128xf32>
    tpu.vector_store %arg10[%c0_30, %c0_31], %59 {strides = array<i32>} : memref<16x128xf32, #tpu.memory_space<vmem>>, vector<16x128xf32>,
    return
  }
  func.func @transform_0(%arg0: i32) -> (i32, i32) {
    %c0_i32 = arith.constant 0 : i32
    %c0_i32_0 = arith.constant 0 : i32
    return %arg0, %c0_i32 : i32, i32
  }
  func.func @transform_1(%arg0: i32) -> (i32, i32) {
    %c0_i32 = arith.constant 0 : i32
    %c0_i32_0 = arith.constant 0 : i32
    return %arg0, %c0_i32 : i32, i32
  }
  func.func @transform_2(%arg0: i32) -> (i32, i32) {
    %c0_i32 = arith.constant 0 : i32
    %c0_i32_0 = arith.constant 0 : i32
    %c0_i32_1 = arith.constant 0 : i32
    return %c0_i32, %c0_i32_0 : i32, i32
  }
  func.func @transform_3(%arg0: i32) -> (i32, i32) {
    %c0_i32 = arith.constant 0 : i32
    %c0_i32_0 = arith.constant 0 : i32
    %c0_i32_1 = arith.constant 0 : i32
    return %c0_i32, %c0_i32_0 : i32, i32
  }
  func.func @transform_4(%arg0: i32) -> (i32, i32) {
    %c0_i32 = arith.constant 0 : i32
    %c0_i32_0 = arith.constant 0 : i32
    %c0_i32_1 = arith.constant 0 : i32
    return %c0_i32, %c0_i32_0 : i32, i32
  }
  func.func @transform_5(%arg0: i32) -> (i32, i32) {
    %c0_i32 = arith.constant 0 : i32
    %c0_i32_0 = arith.constant 0 : i32
    %c0_i32_1 = arith.constant 0 : i32
    return %c0_i32, %c0_i32_0 : i32, i32
  }
  func.func @transform_6(%arg0: i32) -> (i32, i32) {
    %c0_i32 = arith.constant 0 : i32
    %c0_i32_0 = arith.constant 0 : i32
    %c0_i32_1 = arith.constant 0 : i32
    return %c0_i32, %c0_i32_0 : i32, i32
  }
  func.func @transform_7(%arg0: i32) -> (i32, i32) {
    %c0_i32 = arith.constant 0 : i32
    %c0_i32_0 = arith.constant 0 : i32
    %c0_i32_1 = arith.constant 0 : i32
    return %c0_i32, %c0_i32_0 : i32, i32
  }
  func.func @transform_8(%arg0: i32) -> (i32, i32) {
    %c0_i32 = arith.constant 0 : i32
    %c0_i32_0 = arith.constant 0 : i32
    %c0_i32_1 = arith.constant 0 : i32
    return %c0_i32, %c0_i32_0 : i32, i32
  }
  func.func @transform_9(%arg0: i32) -> (i32, i32) {
    %c0_i32 = arith.constant 0 : i32
    %c0_i32_0 = arith.constant 0 : i32
    return %arg0, %c0_i32 : i32, i32
  }
}

</mosaic_0001>

<bundles_post_ra>
// kernel: tpu_custom_call.1
= control target key start
LH: loop header
LB: loop body
LE: loop exit
PB: predicated region body
PF: predicated region fallthrough
CT: control target
= control target key end

     0   :  { %14 = vsyncpa [#allocation3], 0  ;;  %s1084_s0 = inlined_call_operand.hbm [shape: f32[16,128], index: 0, kind: input, shape index: {}]   ;;  %s1085_s1 = inlined_call_operand.hbm [shape: f32[16,128], index: 1, kind: input, shape index: {}]   ;;  %s1086_s2 = inlined_call_operand.vmem [shape: f32[1,128], index: 2, kind: input, shape index: {}]   ;;  %s1087_s3 = inlined_call_operand.hbm [shape: f32[128,256], index: 3, kind: input, shape index: {}]   ;;  %s1088_s4 = inlined_call_operand.vmem [shape: f32[1,256], index: 4, kind: input, shape index: {}]   ;;  %s1089_s5 = inlined_call_operand.hbm [shape: f32[256,128], index: 5, kind: input, shape index: {}]   ;;  %s1090_s6 = inlined_call_operand.vmem [shape: f32[1,128], index: 6, kind: input, shape index: {}]   ;;  %s1091_s7 = inlined_call_operand.hbm [shape: f32[256,128], index: 7, kind: input, shape index: {}]   ;;  %s1092_s8 = inlined_call_operand.vmem [shape: f32[1,128], index: 8, kind: input, shape index: {}]   ;;  %s1093_s9 = inlined_call_operand.hbm [shape: f32[16,128], index: 9, kind: output, shape index: {}]  }
   0x1   :  { %15 = vsyncpa [#allocation6], 0 }
   0x2   :  { %16 = vsyncpa [#allocation9], 0 }
   0x3   :  { %17 = vsyncpa [#allocation4], 0  ;;  %s843_s30 = smov [#allocation5]   ;;  %s844_s11 = smov [#allocation8]  }
   0x4   :  { %s35_s10 = sshll.u32 %s843_s30, 4  ;;  %s63_s12 = sshll.u32 %s844_s11, 4  ;;  %s36_s10 = int_to_ptr.vmem [resolvable:$true] %s35_s10  ;;  %s64_s12 = int_to_ptr.vmem [resolvable:$true] %s63_s12 }
   0x5   :  { %s723_s13 = scalar_lea.vmem %s36_s10, 256  ;;  %p728_p1 = scmp.lt.s32.totalorder %s36_s10, %s36_s10 }
   0x6   :  { %p724_p0 = scmp.ne.s32.totalorder %s36_s10, %s723_s13  ;;  %p729_p2 = scmp.lt.s32.totalorder %s723_s13, %s723_s13 }
   0x8   :  { %p730_p3 = por %p729_p2, %p728_p1 }
   0xa   :  { %p731_p4 = pnand %p730_p3, %p724_p0 }
   0xc   :  { %734 = shalt.err (!%p731_p4)
}
   0xd   :  { %s845_s14 = smov 128   ;;  %s846_s15 = smov 8  }
   0xe   :  { %41 = dma.hbm_to_vmem [thread:$0]  %s1085_s1, 256, %s36_s10, [#allocation6], %s845_s14, %s845_s14, %s846_s15  }
   0xf   :  { %s743_s18 = scalar_lea.vmem %s64_s12, 4096  ;;  %p748_p6 = scmp.lt.s32.totalorder %s64_s12, %s64_s12 }
  0x10   :  { %p744_p5 = scmp.ne.s32.totalorder %s64_s12, %s743_s18  ;;  %p749_p7 = scmp.lt.s32.totalorder %s743_s18, %s743_s18 }
  0x12   :  { %p750_p8 = por %p749_p7, %p748_p6 }
  0x14   :  { %p751_p9 = pnand %p750_p8, %p744_p5 }
  0x16   :  { %754 = shalt.err (!%p751_p9)
}
  0x17   :  { %69 = dma.hbm_to_vmem [thread:$0]  %s1089_s5, 4096, %s64_s12, [#allocation9], %s845_s14, %s845_s14, %s846_s15  }
  0x18   :  { %s847_s21 = smov [#allocation2]   ;;  %s848_s23 = smov [#allocation7]  }
  0x19   :  { %s23_s22 = sshll.u32 %s847_s21, 4  ;;  %s49_s24 = sshll.u32 %s848_s23, 4  ;;  %s24_s22 = int_to_ptr.vmem [resolvable:$true] %s23_s22  ;;  %s50_s24 = int_to_ptr.vmem [resolvable:$true] %s49_s24 }
  0x1a   :  { %s763_s1 = scalar_lea.vmem %s24_s22, 256  ;;  %p768_p11 = scmp.lt.s32.totalorder %s24_s22, %s24_s22 }
  0x1b   :  { %p764_p10 = scmp.ne.s32.totalorder %s24_s22, %s763_s1  ;;  %p769_p12 = scmp.lt.s32.totalorder %s763_s1, %s763_s1 }
  0x1d   :  { %p770_p13 = por %p769_p12, %p768_p11 }
  0x1f   :  { %p771_p0 = pnand %p770_p13, %p764_p10 }
  0x21   :  { %774 = shalt.err (!%p771_p0)
}
  0x22   :  { %29 = dma.hbm_to_vmem [thread:$0]  %s1084_s0, 256, %s24_s22, [#allocation3], %s845_s14, %s845_s14, %s846_s15  }
  0x23   :  { %s783_s5 = scalar_lea.vmem %s50_s24, 4096  ;;  %p788_p2 = scmp.lt.s32.totalorder %s50_s24, %s50_s24 }
  0x24   :  { %p784_p1 = scmp.ne.s32.totalorder %s50_s24, %s783_s5  ;;  %p789_p3 = scmp.lt.s32.totalorder %s783_s5, %s783_s5 }
  0x26   :  { %p790_p4 = por %p789_p3, %p788_p2 }
  0x28   :  { %p791_p5 = pnand %p790_p4, %p784_p1 }
  0x2a   :  { %794 = shalt.err (!%p791_p5)
}
  0x2b   :  { %s849_s27 = smov 256   ;;  %s850_s28 = smov 16  }
  0x2c   :  { %55 = dma.hbm_to_vmem [thread:$0]  %s1087_s3, 4096, %s50_s24, [#allocation6], %s849_s27, %s849_s27, %s850_s28  }
  0x2d   :  { %s851_s10 = smov [#allocation10]  }
  0x2e   :  { %s77_s11 = sshll.u32 %s851_s10, 4  ;;  %s78_s11 = int_to_ptr.vmem [resolvable:$true] %s77_s11 }
  0x2f   :  { %s803_s12 = scalar_lea.vmem %s78_s11, 4096  ;;  %p808_p7 = scmp.lt.s32.totalorder %s78_s11, %s78_s11 }
  0x30   :  { %p804_p6 = scmp.ne.s32.totalorder %s78_s11, %s803_s12  ;;  %p809_p8 = scmp.lt.s32.totalorder %s803_s12, %s803_s12 }
  0x32   :  { %p810_p9 = por %p809_p8, %p808_p7 }
  0x34   :  { %p811_p10 = pnand %p810_p9, %p804_p6 }
  0x36   :  { %814 = shalt.err (!%p811_p10)
}
  0x37   :  { %83 = dma.hbm_to_vmem [thread:$0]  %s1091_s7, 4096, %s78_s11, [#allocation9], %s845_s14, %s845_s14, %s846_s15  }
  0x38   :  { %835 = dma.done.wait [#allocation3], 256  }
  0x39   :  { %836 = vsyncadd [#allocation3], 4294967040 }
  0x3a   :  { %837 = dma.done.wait [#allocation6], 4352  }
  0x3b   :  { %838 = vsyncadd [#allocation6], 4294962944 }
  0x3c   :  { %839 = dma.done.wait [#allocation9], 8192  }
  0x3d   :  { %840 = vsyncadd [#allocation9], 4294959104  ;;  %v852_v0 = vmov 0.0   ;;  %v160_v1 = vld [vmem:[#allocation7 + $0xf8] sm:$0xff]  ;;  %v159_v2 = vld [vmem:[#allocation7 + $0xf0] sm:$0xff] }
  0x3e   :  { %237 = vmatprep.mubr.f32.mxu0 %v852_v0  ;;  %v158_v3 = vld [vmem:[#allocation7 + $0xe8] sm:$0xff]  ;;  %173 = vmatprep.subr.mxu0 %v160_v1  ;;  %v157_v4 = vld [vmem:[#allocation7 + $0xe0] sm:$0xff]  ;;  %v156_v5 = vld [vmem:[#allocation7 + $0xd8] sm:$0xff] }
  0x3f   :  { %174 = vmatpush1.msra.mxu0 %v159_v2  ;;  %v155_v6 = vld [vmem:[#allocation7 + $0xd0] sm:$0xff]  ;;  %v154_v7 = vld [vmem:[#allocation7 + $0xc8] sm:$0xff]  ;;  %v153_v8 = vld [vmem:[#allocation7 + $0xc0] sm:$0xff] }
  0x40   :  { %175 = vmatprep.subr.mxu0 %v158_v3  ;;  %v152_v9 = vld [vmem:[#allocation7 + $0xb8] sm:$0xff]  ;;  %v151_v10 = vld [vmem:[#allocation7 + $0xb0] sm:$0xff]  ;;  %v150_v11 = vld [vmem:[#allocation7 + $0xa8] sm:$0xff] }
  0x41   :  { %176 = vmatpush1.msra.mxu0 %v157_v4  ;;  %v149_v12 = vld [vmem:[#allocation7 + $0xa0] sm:$0xff]  ;;  %v148_v13 = vld [vmem:[#allocation7 + $0x98] sm:$0xff]  ;;  %v147_v14 = vld [vmem:[#allocation7 + $0x90] sm:$0xff] }
  0x42   :  { %177 = vmatprep.subr.mxu0 %v156_v5  ;;  %v146_v15 = vld [vmem:[#allocation7 + $0x88] sm:$0xff]  ;;  %v145_v16 = vld [vmem:[#allocation7 + $0x80] sm:$0xff]  ;;  %v144_v17 = vld [vmem:[#allocation7 + $0x78] sm:$0xff] }
  0x43   :  { %178 = vmatpush1.msra.mxu0 %v155_v6  ;;  %v143_v18 = vld [vmem:[#allocation7 + $0x70] sm:$0xff]  ;;  %v142_v19 = vld [vmem:[#allocation7 + $0x68] sm:$0xff]  ;;  %v141_v20 = vld [vmem:[#allocation7 + $0x60] sm:$0xff] }
  0x44   :  { %179 = vmatprep.subr.mxu0 %v154_v7  ;;  %v140_v21 = vld [vmem:[#allocation7 + $0x58] sm:$0xff]  ;;  %v139_v22 = vld [vmem:[#allocation7 + $0x50] sm:$0xff]  ;;  %v138_v23 = vld [vmem:[#allocation7 + $0x48] sm:$0xff] }
  0x45   :  { %180 = vmatpush1.msra.mxu0 %v153_v8  ;;  %v137_v24 = vld [vmem:[#allocation7 + $0x40] sm:$0xff]  ;;  %v136_v25 = vld [vmem:[#allocation7 + $0x38] sm:$0xff]  ;;  %v135_v26 = vld [vmem:[#allocation7 + $0x30] sm:$0xff] }
  0x46   :  { %181 = vmatprep.subr.mxu0 %v152_v9  ;;  %v134_v27 = vld [vmem:[#allocation7 + $0x28] sm:$0xff]  ;;  %v133_v28 = vld [vmem:[#allocation7 + $0x20] sm:$0xff]  ;;  %v132_v29 = vld [vmem:[#allocation7 + $0x18] sm:$0xff] }
  0x47   :  { %182 = vmatpush1.msra.mxu0 %v151_v10  ;;  %v131_v30 = vld [vmem:[#allocation7 + $0x10] sm:$0xff]  ;;  %v130_v31 = vld [vmem:[#allocation7 + $0x8] sm:$0xff]  ;;  %v129_v32 = vld [vmem:[#allocation7] sm:$0xff] }
  0x48   :  { %183 = vmatprep.subr.mxu0 %v150_v11  ;;  %v127_v33 = vld [vmem:[#allocation5] sm:$0xff]  ;;  %v128_v34 = vld [vmem:[#allocation5 + $0x8] sm:$0xff]  ;;  %v307_v42 = vld [vmem:[#allocation8 + $0xe8] sm:$0xff] }
  0x49   :  { %184 = vmatpush1.msra.mxu0 %v149_v12  ;;  %v309_v35 = vld [vmem:[#allocation8 + $0xf8] sm:$0xff]  ;;  %v308_v38 = vld [vmem:[#allocation8 + $0xf0] sm:$0xff]  ;;  %v291_v44 = vld [vmem:[#allocation8 + $0x68] sm:$0xff] }
  0x4a   :  { %185 = vmatprep.subr.mxu0 %v148_v13  ;;  %568 = vmatprep.subr.mxu1 %v309_v35  ;;  %v293_v36 = vld [vmem:[#allocation8 + $0x78] sm:$0xff]  ;;  %v292_v40 = vld [vmem:[#allocation8 + $0x70] sm:$0xff]  ;;  %v945_v45 = vld [vmem:[#allocation10 + $0xe8] sm:$0xff]  ;;  %v163_v35 = vlaneseq }
  0x4b   :  { %186 = vmatpush1.msra.mxu0 %v147_v14  ;;  %v933_v37 = vld [vmem:[#allocation10 + $0xf8] sm:$0xff]  ;;  %569 = vmatpush3.msra.mxu1 %v293_v36  ;;  %v939_v41 = vld [vmem:[#allocation10 + $0xf0] sm:$0xff]  ;;  %v306_v46 = vld [vmem:[#allocation8 + $0xe0] sm:$0xff] }
  0x4c   :  { %187 = vmatprep.subr.mxu0 %v146_v15  ;;  %v936_v39 = vld [vmem:[#allocation10 + $0x78] sm:$0xff]  ;;  %570 = vmatprep.subr.mxu1 %v308_v38  ;;  %v942_v43 = vld [vmem:[#allocation10 + $0x70] sm:$0xff]  ;;  %v948_v47 = vld [vmem:[#allocation10 + $0x68] sm:$0xff]  ;;  %v164_v36 = vshrl.u32 %v163_v35, 7 }
  0x4d   :  { %188 = vmatpush1.msra.mxu0 %v145_v16  ;;  %571 = vmatpush3.msra.mxu1 %v292_v40  ;;  %v290_v48 = vld [vmem:[#allocation8 + $0x60] sm:$0xff]  ;;  %v305_v50 = vld [vmem:[#allocation8 + $0xd8] sm:$0xff]  ;;  %v304_v54 = vld [vmem:[#allocation8 + $0xd0] sm:$0xff] }
  0x4e   :  { %189 = vmatprep.subr.mxu0 %v144_v17  ;;  %572 = vmatprep.subr.mxu1 %v307_v42  ;;  %v951_v49 = vld [vmem:[#allocation10 + $0xe0] sm:$0xff]  ;;  %v289_v52 = vld [vmem:[#allocation8 + $0x58] sm:$0xff]  ;;  %v288_v56 = vld [vmem:[#allocation8 + $0x50] sm:$0xff]  ;;  %v165_v38 = vsub.s32 0, %v164_v36  ;;  %v169_v42 = vsub.s32 1, %v164_v36 }
  0x4f   :  { %190 = vmatpush1.msra.mxu0 %v143_v18  ;;  %573 = vmatpush3.msra.mxu1 %v291_v44  ;;  %v954_v51 = vld [vmem:[#allocation10 + $0x60] sm:$0xff]  ;;  %v957_v53 = vld [vmem:[#allocation10 + $0xd8] sm:$0xff]  ;;  %v963_v57 = vld [vmem:[#allocation10 + $0xd0] sm:$0xff] }
  0x50   :  { %191 = vmatprep.subr.mxu0 %v142_v19  ;;  %574 = vmatprep.subr.mxu1 %v306_v46  ;;  %v960_v55 = vld [vmem:[#allocation10 + $0x58] sm:$0xff]  ;;  %v303_v58 = vld [vmem:[#allocation8 + $0xc8] sm:$0xff]  ;;  %v966_v59 = vld [vmem:[#allocation10 + $0x50] sm:$0xff] }
  0x51   :  { %192 = vmatpush1.msra.mxu0 %v141_v20  ;;  %575 = vmatpush3.msra.mxu1 %v290_v48  ;;  %v287_v60 = vld [vmem:[#allocation8 + $0x48] sm:$0xff]  ;;  %v302_v62 = vld [vmem:[#allocation8 + $0xc0] sm:$0xff]  ;;  %v301_v2 = vld [vmem:[#allocation8 + $0xb8] sm:$0xff] }
  0x52   :  { %193 = vmatprep.subr.mxu0 %v140_v21  ;;  %576 = vmatprep.subr.mxu1 %v305_v50  ;;  %v969_v61 = vld [vmem:[#allocation10 + $0xc8] sm:$0xff]  ;;  %v975_v1 = vld [vmem:[#allocation10 + $0xc0] sm:$0xff]  ;;  %v285_v4 = vld [vmem:[#allocation8 + $0x38] sm:$0xff] }
  0x53   :  { %194 = vmatpush1.msra.mxu0 %v139_v22  ;;  %577 = vmatpush3.msra.mxu1 %v289_v52  ;;  %v972_v63 = vld [vmem:[#allocation10 + $0x48] sm:$0xff]  ;;  %v978_v3 = vld [vmem:[#allocation10 + $0x40] sm:$0xff]  ;;  %v981_v5 = vld [vmem:[#allocation10 + $0xb8] sm:$0xff] }
  0x54   :  { %195 = vmatprep.subr.mxu0 %v138_v23  ;;  %578 = vmatprep.subr.mxu1 %v304_v54  ;;  %v300_v6 = vld [vmem:[#allocation8 + $0xb0] sm:$0xff]  ;;  %v984_v7 = vld [vmem:[#allocation10 + $0x38] sm:$0xff]  ;;  %v299_v10 = vld [vmem:[#allocation8 + $0xa8] sm:$0xff] }
  0x55   :  { %196 = vmatpush1.msra.mxu0 %v137_v24  ;;  %579 = vmatpush3.msra.mxu1 %v288_v56  ;;  %v284_v8 = vld [vmem:[#allocation8 + $0x30] sm:$0xff]  ;;  %v283_v12 = vld [vmem:[#allocation8 + $0x28] sm:$0xff]  ;;  %v298_v14 = vld [vmem:[#allocation8 + $0xa0] sm:$0xff] }
  0x56   :  { %197 = vmatprep.subr.mxu0 %v136_v25  ;;  %580 = vmatprep.subr.mxu1 %v303_v58  ;;  %v987_v9 = vld [vmem:[#allocation10 + $0xb0] sm:$0xff]  ;;  %v993_v13 = vld [vmem:[#allocation10 + $0xa8] sm:$0xff]  ;;  %v282_v16 = vld [vmem:[#allocation8 + $0x20] sm:$0xff] }
  0x57   :  { %198 = vmatpush1.msra.mxu0 %v135_v26  ;;  %581 = vmatpush3.msra.mxu1 %v287_v60  ;;  %v990_v11 = vld [vmem:[#allocation10 + $0x30] sm:$0xff]  ;;  %v996_v15 = vld [vmem:[#allocation10 + $0x28] sm:$0xff]  ;;  %v999_v17 = vld [vmem:[#allocation10 + $0xa0] sm:$0xff] }
  0x58   :  { %199 = vmatprep.subr.mxu0 %v134_v27  ;;  %582 = vmatprep.subr.mxu1 %v302_v62  ;;  %v297_v18 = vld [vmem:[#allocation8 + $0x98] sm:$0xff]  ;;  %v1002_v19 = vld [vmem:[#allocation10 + $0x20] sm:$0xff]  ;;  %v296_v22 = vld [vmem:[#allocation8 + $0x90] sm:$0xff] }
  0x59   :  { %200 = vmatpush1.msra.mxu0 %v133_v28  ;;  %v281_v20 = vld [vmem:[#allocation8 + $0x18] sm:$0xff]  ;;  %v280_v24 = vld [vmem:[#allocation8 + $0x10] sm:$0xff]  ;;  %v295_v26 = vld [vmem:[#allocation8 + $0x88] sm:$0xff] }
  0x5a   :  { %201 = vmatprep.subr.mxu0 %v132_v29  ;;  %v1005_v21 = vld [vmem:[#allocation10 + $0x98] sm:$0xff]  ;;  %v1011_v25 = vld [vmem:[#allocation10 + $0x90] sm:$0xff]  ;;  %v279_v28 = vld [vmem:[#allocation8 + $0x8] sm:$0xff] }
  0x5b   :  { %202 = vmatpush1.msra.mxu0 %v131_v30  ;;  %v1008_v23 = vld [vmem:[#allocation10 + $0x18] sm:$0xff]  ;;  %v1014_v27 = vld [vmem:[#allocation10 + $0x10] sm:$0xff]  ;;  %v1017_v29 = vld [vmem:[#allocation10 + $0x88] sm:$0xff] }
  0x5c   :  { %203 = vmatprep.subr.mxu0 %v130_v31  ;;  %v294_v30 = vld [vmem:[#allocation8 + $0x80] sm:$0xff]  ;;  %v1020_v31 = vld [vmem:[#allocation10 + $0x8] sm:$0xff] }
  0x5d   :  { %204 = vmatpush1.msra.mxu0 %v129_v32  ;;  %v278_v32 = vld [vmem:[#allocation8] sm:$0xff] }
  0x5e   :  { %238 = vmatmul.mubr.f32.vlgmr.msra.gmra.mxu0 %v127_v33  ;;  %606 = vmatprep.subr.mxu0 %v933_v37  ;;  %v1023_v33 = vld [vmem:[#allocation10 + $0x80] sm:$0xff] }
  0x5f   :  { %243 = vmatprep.mubr.f32.mxu0 %v852_v0  ;;  %607 = vmatpush3.msra.mxu0 %v936_v39  ;;  %v286_v0 = vld [vmem:[#allocation8 + $0x40] sm:$0xff] }
  0x60   :  { %608 = vmatprep.subr.mxu0 %v939_v41  ;;  %583 = vmatpush3.msra.mxu1 %v286_v0  ;;  %v161_v40 = vld [vmem:[%s1088_s4] sm:$0x3] }
  0x61   :  { %609 = vmatpush3.msra.mxu0 %v942_v43  ;;  %584 = vmatprep.subr.mxu1 %v301_v2  ;;  %v166_v44 = vrot.slane %v161_v40, %v165_v38  ;;  %v170_v46 = vrot.slane %v161_v40, %v169_v42 }
  0x62   :  { %244 = vmatmul.mubr.f32.gmra.mxu0 %v128_v34  ;;  %610 = vmatprep.subr.mxu0 %v945_v45  ;;  %v1026_v34 = vld [vmem:[#allocation10] sm:$0xff] }
  0x63   :  { %611 = vmatpush3.msra.mxu0 %v948_v47  ;;  %585 = vmatpush3.msra.mxu1 %v285_v4 }
  0x64   :  { %612 = vmatprep.subr.mxu0 %v951_v49  ;;  %586 = vmatprep.subr.mxu1 %v300_v6 }
  0x65   :  { %613 = vmatpush3.msra.mxu0 %v954_v51  ;;  %587 = vmatpush3.msra.mxu1 %v284_v8 }
  0x66   :  { %614 = vmatprep.subr.mxu0 %v957_v53  ;;  %588 = vmatprep.subr.mxu1 %v299_v10 }
  0x67   :  { %615 = vmatpush3.msra.mxu0 %v960_v55  ;;  %589 = vmatpush3.msra.mxu1 %v283_v12 }
  0x68   :  { %616 = vmatprep.subr.mxu0 %v963_v57  ;;  %590 = vmatprep.subr.mxu1 %v298_v14 }
  0x69   :  { %617 = vmatpush3.msra.mxu0 %v966_v59  ;;  %591 = vmatpush3.msra.mxu1 %v282_v16 }
  0x6a   :  { %618 = vmatprep.subr.mxu0 %v969_v61  ;;  %592 = vmatprep.subr.mxu1 %v297_v18 }
  0x6b   :  { %619 = vmatpush3.msra.mxu0 %v972_v63  ;;  %593 = vmatpush3.msra.mxu1 %v281_v20 }
  0x6c   :  { %620 = vmatprep.subr.mxu0 %v975_v1  ;;  %594 = vmatprep.subr.mxu1 %v296_v22 }
  0x6d   :  { %621 = vmatpush3.msra.mxu0 %v978_v3  ;;  %595 = vmatpush3.msra.mxu1 %v280_v24 }
  0x6e   :  { %622 = vmatprep.subr.mxu0 %v981_v5  ;;  %596 = vmatprep.subr.mxu1 %v295_v26 }
  0x6f   :  { %623 = vmatpush3.msra.mxu0 %v984_v7  ;;  %597 = vmatpush3.msra.mxu1 %v279_v28 }
  0x70   :  { %624 = vmatprep.subr.mxu0 %v987_v9  ;;  %598 = vmatprep.subr.mxu1 %v294_v30 }
  0x71   :  { %625 = vmatpush3.msra.mxu0 %v990_v11  ;;  %599 = vmatpush3.msra.mxu1 %v278_v32 }
  0x72   :  { %626 = vmatprep.subr.mxu0 %v993_v13  ;;  %644 = vmatprep.subr.mxu1 %v933_v37 }
  0x73   :  { %627 = vmatpush3.msra.mxu0 %v996_v15 }
  0x74   :  { %628 = vmatprep.subr.mxu0 %v999_v17 }
  0x75   :  { %629 = vmatpush3.msra.mxu0 %v1002_v19 }
  0x76   :  { %630 = vmatprep.subr.mxu0 %v1005_v21 }
  0x77   :  { %631 = vmatpush3.msra.mxu0 %v1008_v23 }
  0x78   :  { %632 = vmatprep.subr.mxu0 %v1011_v25 }
  0x79   :  { %633 = vmatpush3.msra.mxu0 %v1014_v27 }
  0x7a   :  { %634 = vmatprep.subr.mxu0 %v1017_v29 }
  0x7b   :  { %635 = vmatpush3.msra.mxu0 %v1020_v31 }
  0x7c   :  { %636 = vmatprep.subr.mxu0 %v1023_v33 }
  0x7d   :  { %637 = vmatpush3.msra.mxu0 %v1026_v34 }
 0x11e   :  { %v239_v48 = vpop.f32.mrf.mxu0 }
 0x11f   :  { %v240_v50 = vadd.f32 %v239_v48, %v166_v44 }
 0x120   :  { %v241_v52 = vpop.f32.mrf.mxu0 }
 0x121   :  { %v562_v54 = vmul.f32 -1.442695, %v240_v50  ;;  %v242_v56 = vadd.f32 %v241_v52, %v170_v46 }
 0x122   :  { %v245_v58 = vpop.f32.mrf.mxu0 }
 0x123   :  { %687 = vpow2.f32 %v562_v54  ;;  %v563_v37 = vmul.f32 -1.442695, %v242_v56  ;;  %v246_v60 = vadd.f32 %v245_v58, %v166_v44  ;;  %v561_v54 = vld [vmem:[%s1086_s2] ss:$0 sm:$0xff]  ;;  %s853_s2 = smov [#allocation11]  }
 0x124   :  { %v247_v62 = vpop.f32.mrf.mxu0  ;;  %s547_s19 = sshll.u32 %s853_s2, 4  ;;  %s548_s19 = int_to_ptr.vmem [resolvable:$true] %s547_s19 }
 0x125   :  { %689 = vpow2.f32 %v563_v37  ;;  %v564_v0 = vmul.f32 -1.442695, %v246_v60  ;;  %v248_v2 = vadd.f32 %v247_v62, %v170_v46  ;;  %s815_s20 = scalar_lea.vmem %s548_s19, 256  ;;  %p820_p12 = scmp.lt.s32.totalorder %s548_s19, %s548_s19 }
 0x126   :  { %p816_p11 = scmp.ne.s32.totalorder %s548_s19, %s815_s20  ;;  %p821_p13 = scmp.lt.s32.totalorder %s815_s20, %s815_s20 }
 0x127   :  { %691 = vpow2.f32 %v564_v0  ;;  %v565_v4 = vmul.f32 -1.442695, %v248_v2 }
 0x128   :  { %p822_p0 = por %p821_p13, %p820_p12 }
 0x129   :  { %693 = vpow2.f32 %v565_v4 }
 0x12a   :  { %p823_p1 = pnand %p822_p0, %p816_p11 }
 0x130   :  { %v688_v6 = vpop.eup %687 }
 0x131   :  { %v262_v8 = vadd.f32 1.0, %v688_v6 }
 0x132   :  { %v690_v10 = vpop.eup %689 }
 0x133   :  { %v263_v12 = vadd.f32 1.0, %v690_v10  ;;  %695 = vrcp.f32 %v262_v8 }
 0x134   :  { %v692_v14 = vpop.eup %691 }
 0x135   :  { %697 = vrcp.f32 %v263_v12  ;;  %v264_v16 = vadd.f32 1.0, %v692_v14 }
 0x136   :  { %v694_v18 = vpop.eup %693 }
 0x137   :  { %v265_v20 = vadd.f32 1.0, %v694_v18  ;;  %699 = vrcp.f32 %v264_v16 }
 0x139   :  { %701 = vrcp.f32 %v265_v20 }
 0x140   :  { %v696_v22 = vpop.eup %695 }
 0x141   :  { %v274_v28 = vmul.f32 %v696_v22, %v240_v50 }
 0x142   :  { %v698_v24 = vpop.eup %697 }
 0x143   :  { %v275_v26 = vmul.f32 %v698_v24, %v242_v56 }
 0x144   :  { %v700_v30 = vpop.eup %699 }
 0x145   :  { %381 = vmatprep.mubr.f32.mxu1 %v275_v26  ;;  %495 = vmatprep.mubr.f32.mxu0 %v275_v26  ;;  %v276_v36 = vmul.f32 %v700_v30, %v246_v60 }
 0x146   :  { %v702_v32 = vpop.eup %701  ;;  %382 = vmatmul.mubr.f32.vlgmr.msra.gmra.mxu1 %v274_v28  ;;  %496 = vmatmul.mubr.f32.vlgmr.msra.gmra.mxu0 %v274_v28 }
 0x147   :  { %v277_v35 = vmul.f32 %v702_v32, %v248_v2  ;;  %660 = vmatpush3.msra.mxu1 %v936_v39  ;;  %v101_v39 = vld [vmem:[#allocation2] sm:$0xff] }
 0x148   :  { %645 = vmatprep.subr.mxu1 %v939_v41  ;;  %v104_v41 = vmul.f32 %v101_v39, %v101_v39 }
 0x149   :  { %661 = vmatpush3.msra.mxu1 %v942_v43  ;;  %386 = vmatprep.mubr.f32.mxu1 %v277_v35  ;;  %v1064_v43 = vld [vmem:[#allocation2 + $0x8] sm:$0xff] }
 0x14a   :  { %646 = vmatprep.subr.mxu1 %v945_v45  ;;  %387 = vmatmul.mubr.f32.gmra.mxu1 %v276_v36  ;;  %v105_v45 = vmul.f32 %v1064_v43, %v1064_v43 }
 0x14b   :  { %662 = vmatpush3.msra.mxu1 %v948_v47  ;;  %500 = vmatprep.mubr.f32.mxu1 %v277_v35 }
 0x14c   :  { %647 = vmatprep.subr.mxu1 %v951_v49  ;;  %106 = vadd.xlane.f32.xlu0 %v104_v41 }
 0x14d   :  { %663 = vmatpush3.msra.mxu1 %v954_v51 }
 0x14e   :  { %648 = vmatprep.subr.mxu1 %v957_v53  ;;  %v567_v53 = vld [vmem:[%s1092_s8] ss:$0 sm:$0xff] }
 0x14f   :  { %664 = vmatpush3.msra.mxu1 %v960_v55 }
 0x150   :  { %649 = vmatprep.subr.mxu1 %v963_v57  ;;  %108 = vadd.xlane.f32.xlu0 %v105_v45  ;;  %v566_v57 = vld [vmem:[%s1090_s6] ss:$0 sm:$0xff] }
 0x151   :  { %665 = vmatpush3.msra.mxu1 %v966_v59 }
 0x152   :  { %650 = vmatprep.subr.mxu1 %v969_v61 }
 0x153   :  { %666 = vmatpush3.msra.mxu1 %v972_v63 }
 0x154   :  { %651 = vmatprep.subr.mxu1 %v975_v1 }
 0x155   :  { %667 = vmatpush3.msra.mxu1 %v978_v3 }
 0x156   :  { %652 = vmatprep.subr.mxu1 %v981_v5 }
 0x157   :  { %668 = vmatpush3.msra.mxu1 %v984_v7 }
 0x158   :  { %653 = vmatprep.subr.mxu1 %v987_v9 }
 0x159   :  { %669 = vmatpush3.msra.mxu1 %v990_v11 }
 0x15a   :  { %654 = vmatprep.subr.mxu1 %v993_v13 }
 0x15b   :  { %670 = vmatpush3.msra.mxu1 %v996_v15 }
 0x15c   :  { %655 = vmatprep.subr.mxu1 %v999_v17 }
 0x15d   :  { %671 = vmatpush3.msra.mxu1 %v1002_v19 }
 0x15e   :  { %656 = vmatprep.subr.mxu1 %v1005_v21 }
 0x15f   :  { %672 = vmatpush3.msra.mxu1 %v1008_v23 }
 0x160   :  { %657 = vmatprep.subr.mxu1 %v1011_v25 }
 0x161   :  { %673 = vmatpush3.msra.mxu1 %v1014_v27 }
 0x162   :  { %658 = vmatprep.subr.mxu1 %v1017_v29 }
 0x163   :  { %674 = vmatpush3.msra.mxu1 %v1020_v31 }
 0x164   :  { %659 = vmatprep.subr.mxu1 %v1023_v33 }
 0x165   :  { %675 = vmatpush3.msra.mxu1 %v1026_v34 }
 0x166   :  { %501 = vmatmul.mubr.f32.vlgmr.msra.gmra.mxu1 %v276_v36 }
 0x1d5   :  { %v107_v27 = vpop.xlane.xlu0 %106 }
 0x1d6   :  { %v111_v29 = vmul.f32 0.0078125, %v107_v27 }
 0x1d8   :  { %v113_v33 = vadd.f32 1e-08, %v111_v29 }
 0x1d9   :  { %v109_v31 = vpop.xlane.xlu0 %108 }
 0x1da   :  { %703 = vrsqrt.f32 %v113_v33  ;;  %v112_v58 = vmul.f32 0.0078125, %v109_v31 }
 0x1dc   :  { %v114_v4 = vadd.f32 1e-08, %v112_v58 }
 0x1e7   :  { %v704_v48 = vpop.eup %703 }
 0x1e8   :  { %v117_v50 = vmul.f32 %v704_v48, %v101_v39 }
 0x1ea   :  { %v125_v60 = vmul.f32 %v561_v54, %v117_v50 }
 0x206   :  { %v600_v47 = vpop.f32.mrf.mxu1  ;;  %v638_v49 = vpop.f32.mrf.mxu0 }
 0x208   :  { %v601_v51 = vpop.f32.mrf.mxu1  ;;  %v639_v55 = vpop.f32.mrf.mxu0 }
 0x209   :  { %v602_v59 = vadd.f32 %v601_v51, %v600_v47  ;;  %v640_v61 = vadd.f32 %v639_v55, %v638_v49 }
 0x20a   :  { %v603_v63 = vpop.f32.mrf.mxu1 }
 0x20b   :  { %v498_v1 = vadd.f32 %v640_v61, %v567_v53  ;;  %v384_v3 = vadd.f32 %v602_v59, %v566_v57 }
 0x20c   :  { %v604_v5 = vpop.f32.mrf.mxu1 }
 0x20d   :  { %v605_v7 = vadd.f32 %v604_v5, %v603_v63  ;;  %v506_v9 = vmul.f32 %v384_v3, %v384_v3  ;;  %v520_v11 = vmul.f32 %v498_v1, %v498_v1 }
 0x20f   :  { %v389_v13 = vadd.f32 %v605_v7, %v566_v57  ;;  %508 = vadd.xlane.f32.xlu1 %v506_v9  ;;  %522 = vadd.xlane.f32.xlu0 %v520_v11 }
 0x211   :  { %v507_v15 = vmul.f32 %v389_v13, %v389_v13 }
 0x213   :  { %510 = vadd.xlane.f32.xlu1 %v507_v15 }
 0x226   :  { %v641_v17 = vpop.f32.mrf.mxu1 }
 0x228   :  { %v642_v19 = vpop.f32.mrf.mxu1 }
 0x229   :  { %v643_v21 = vadd.f32 %v642_v19, %v641_v17 }
 0x22b   :  { %v503_v23 = vadd.f32 %v643_v21, %v567_v53 }
 0x22d   :  { %v521_v25 = vmul.f32 %v503_v23, %v503_v23 }
 0x22f   :  { %524 = vadd.xlane.f32.xlu1 %v521_v25 }
 0x298   :  { %v509_v34 = vpop.xlane.xlu1 %508  ;;  %v523_v38 = vpop.xlane.xlu0 %522 }
 0x299   :  { %v512_v40 = vmul.f32 0.0078125, %v509_v34  ;;  %v526_v42 = vmul.f32 0.0078125, %v523_v38 }
 0x29b   :  { %v514_v44 = vadd.f32 1e-08, %v512_v40  ;;  %v528_v46 = vadd.f32 1e-08, %v526_v42 }
 0x29c   :  { %v511_v52 = vpop.xlane.xlu1 %510 }
 0x29d   :  { %705 = vrsqrt.f32 %v514_v44  ;;  %v513_v37 = vmul.f32 0.0078125, %v511_v52 }
 0x29e   :  { %707 = vrsqrt.f32 %v528_v46 }
 0x29f   :  { %v515_v6 = vadd.f32 1e-08, %v513_v37  ;;  %709 = vrsqrt.f32 %v114_v4 }
 0x2a1   :  { %711 = vrsqrt.f32 %v515_v6 }
 0x2aa   :  { %v706_v56 = vpop.eup %705 }
 0x2ab   :  { %v518_v62 = vmul.f32 %v706_v56, %v384_v3  ;;  %v708_v0 = vpop.eup %707 }
 0x2ac   :  { %v532_v8 = vmul.f32 %v708_v0, %v498_v1  ;;  %v710_v20 = vpop.eup %709 }
 0x2ad   :  { %v534_v2 = vadd.f32 1.0, %v518_v62  ;;  %v118_v24 = vmul.f32 %v710_v20, %v1064_v43 }
 0x2ae   :  { %v712_v22 = vpop.eup %711 }
 0x2af   :  { %v536_v10 = vmul.f32 %v534_v2, %v125_v60  ;;  %v519_v26 = vmul.f32 %v712_v22, %v389_v13  ;;  %v126_v28 = vmul.f32 %v561_v54, %v118_v24 }
 0x2b1   :  { %v538_v12 = vadd.f32 %v536_v10, %v532_v8  ;;  %v535_v30 = vadd.f32 1.0, %v519_v26 }
 0x2b3   :  { %540 = vst [vmem:[#allocation11] sm:$0xff] %v538_v12  ;;  %v537_v36 = vmul.f32 %v535_v30, %v126_v28 }
 0x2b8   :  { %v525_v14 = vpop.xlane.xlu1 %524 }
 0x2b9   :  { %v527_v16 = vmul.f32 0.0078125, %v525_v14 }
 0x2bb   :  { %v529_v18 = vadd.f32 1e-08, %v527_v16 }
 0x2bd   :  { %713 = vrsqrt.f32 %v529_v18 }
 0x2ca   :  { %v714_v32 = vpop.eup %713 }
 0x2cb   :  { %v533_v35 = vmul.f32 %v714_v32, %v503_v23 }
 0x2cd   :  { %v539_v39 = vadd.f32 %v537_v36, %v533_v35 }
 0x2cf   :  { %541 = vst [vmem:[#allocation11 + $0x8] sm:$0xff] %v539_v39 }
 0x2d0   :  { %826 = shalt.err (!%p823_p1)
}
 0x2d1   :  { %553 = dma.vmem_to_hbm [thread:$0]  %s548_s19, 256, %s1093_s9, [#allocation4], %s845_s14, %s845_s14, %s846_s15  }
 0x2d2   :  { %841 = dma.done.wait [#allocation4], 256  }
 0x2d3   :  { %842 = vsyncadd [#allocation4], 4294967040 }
 0x2d4   :  { %557 = vsyncpa [#allocation3], 1 }
 0x2d5   :  { %558 = vsyncpa [#allocation6], 1 }
 0x2d6   :  { %559 = vsyncpa [#allocation9], 1 }
 0x2d7   :  { %560 = vsyncpa [#allocation4], 1 }

</bundles_post_ra>
